<compile_context>
chip_gen: v7x
topology: tpu7x:2x2x1
jax: 0.10.0
libtpu: 0.0.40
codegen_flags: <defaults>
</compile_context>

<pallas_src>
import math

import jax
import jax.numpy as jnp
from jax.experimental import pallas as pl
from jax.experimental.pallas import tpu as pltpu


def _add_pe_kernel(x_ref, pe_ref, o_ref):
    """x_ref/o_ref: (B, l_tile) tiles of the flattened input/output.
    pe_ref: (1, l_tile) tile of the flattened PE row, broadcast over batch."""
    o_ref[...] = x_ref[...] + pe_ref[...]


def _build_pos_enc(seq_len, dim, dtype):
    """Exactly the PyTorch buffer: even lanes sin, odd lanes cos."""
    position = jnp.arange(seq_len, dtype=jnp.float32)[:, None]            # (S, 1)
    div_term = jnp.exp(
        jnp.arange(0, dim, 2, dtype=jnp.float32) * (-math.log(10000.0) / dim)
    )                                                                      # (D/2,)
    ang = position * div_term                                              # (S, D/2)
    # Interleave [sin, cos] pairs along the feature axis -> (S, D).
    pe = jnp.stack([jnp.sin(ang), jnp.cos(ang)], axis=-1).reshape(seq_len, dim)
    return pe.astype(dtype)


def sinusoidal_positional_encoding(x, target_block_bytes=2 << 20):
    """x: (batch, seq_len, dim) -> x + pos_enc[:seq_len, :] (module semantics)."""
    B, S, D = x.shape
    L = S * D
    itemsize = jnp.dtype(x.dtype).itemsize

    # Module buffer, computed once in the wrapper (exact, output dtype).
    pe = _build_pos_enc(S, D, x.dtype).reshape(1, L)
    x2 = x.reshape(B, L)  # lane-dense view: last dim = S*D lanes

    # Lane-tile selection:
    #   - tiny extents: a single full-extent block (always layout-legal),
    #   - otherwise: multiples of 128 lanes, ~target_block_bytes of x per
    #     step, and at least 2 grid steps so v7x megacore can shard.
    if L <= 256 or (L // 128) < 2:
        l_tile = L
    else:
        target_elems = max(128, target_block_bytes // max(1, B * itemsize))
        l_tile = min(target_elems, pl.cdiv(L, 2))
        l_tile = max(128, (l_tile // 128) * 128)
    grid = (pl.cdiv(L, l_tile),)

    # VMEM budget: (x_in + out) * B + pe, double-buffered, with headroom;
    # capped well under v7x's 64 MiB physical VMEM.
    block_bytes = (2 * B * l_tile + l_tile) * itemsize
    vmem_limit = int(min(48 << 20, max(16 << 20, 3 * block_bytes)))

    out2 = pl.pallas_call(
        _add_pe_kernel,
        out_shape=jax.ShapeDtypeStruct((B, L), x.dtype),
        grid=grid,
        in_specs=[
            pl.BlockSpec((B, l_tile), lambda i: (0, i)),
            pl.BlockSpec((1, l_tile), lambda i: (0, i)),
        ],
        out_specs=pl.BlockSpec((B, l_tile), lambda i: (0, i)),
        compiler_params=pltpu.CompilerParams(
            dimension_semantics=("parallel",),
            vmem_limit_bytes=vmem_limit,
        ),
    )(x2, pe)
    return out2.reshape(B, S, D)


def _reference(x):
    """Pure-JAX reference matching the PyTorch module exactly."""
    B, S, D = x.shape
    position = jnp.arange(S, dtype=jnp.float32)[:, None]
    div_term = jnp.exp(
        jnp.arange(0, D, 2, dtype=jnp.float32) * (-math.log(10000.0) / D)
    )
    pe = jnp.zeros((S, D), dtype=jnp.float32)
    pe = pe.at[:, 0::2].set(jnp.sin(position * div_term))
    pe = pe.at[:, 1::2].set(jnp.cos(position * div_term))
    return x + pe[None, :, :].astype(x.dtype)


if __name__ == "__main__":
    # Shape implied by the module's usage: x = randn(1, seq_len=10, dim=16).
    x = jax.random.normal(jax.random.PRNGKey(0), (1, 10, 16), dtype=jnp.float32)
    out = jax.block_until_ready(sinusoidal_positional_encoding(x))
    ref = _reference(x)
    assert out.shape == x.shape and out.dtype == x.dtype
    assert jnp.allclose(out, ref, atol=1e-6, rtol=1e-6), "mismatch vs reference"

    # Larger shape exercising a multi-step, lane-dense, exactly-divisible grid.
    x2 = jax.random.normal(
        jax.random.PRNGKey(1), (2, 256, 128), dtype=jnp.float32
    )
    out2 = jax.block_until_ready(sinusoidal_positional_encoding(x2))
    assert jnp.allclose(out2, _reference(x2), atol=1e-6, rtol=1e-6), "mismatch (tiled)"

    print("KERNEL_OK")
</pallas_src>

<mosaic_0001>
module attributes {stable_mosaic.version = 11 : i64} {
  func.func @_add_pe_kernel(%arg0: i32, %arg1: memref<1x160xf32, #tpu.memory_space<vmem>>, %arg2: memref<1x160xf32, #tpu.memory_space<vmem>>, %arg3: memref<1x160xf32, #tpu.memory_space<vmem>>) attributes {dimension_semantics = [#tpu.dimension_semantics<parallel>], iteration_bounds = array<i64: 1>, scalar_prefetch = 0 : i64, scratch_operands = 0 : i64, tpu.core_type = #tpu.core_type<tc>, window_params = [{transform_indices = @transform_0, window_bounds = array<i64: 1, 160>}, {transform_indices = @transform_1, window_bounds = array<i64: 1, 160>}, {transform_indices = @transform_2, window_bounds = array<i64: 1, 160>}]} {
    %c0 = arith.constant 0 : index
    %c0_0 = arith.constant 0 : index
    %0 = vector.load %arg1[%c0, %c0_0] : memref<1x160xf32, #tpu.memory_space<vmem>>, vector<1x160xf32>
    %c0_1 = arith.constant 0 : index
    %c0_2 = arith.constant 0 : index
    %1 = vector.load %arg2[%c0_1, %c0_2] : memref<1x160xf32, #tpu.memory_space<vmem>>, vector<1x160xf32>
    %2 = arith.addf %0, %1 : vector<1x160xf32>
    %c0_3 = arith.constant 0 : index
    %c0_4 = arith.constant 0 : index
    %3 = vector.load %arg3[%c0_3, %c0_4] : memref<1x160xf32, #tpu.memory_space<vmem>>, vector<1x160xf32>
    tpu.vector_store %arg3[%c0_3, %c0_4], %2 {strides = array<i32>} : memref<1x160xf32, #tpu.memory_space<vmem>>, vector<1x160xf32>,
    return
  }
  func.func @transform_0(%arg0: i32) -> (i32, i32) {
    %c0_i32 = arith.constant 0 : i32
    %c0_i32_0 = arith.constant 0 : i32
    return %c0_i32, %arg0 : i32, i32
  }
  func.func @transform_1(%arg0: i32) -> (i32, i32) {
    %c0_i32 = arith.constant 0 : i32
    %c0_i32_0 = arith.constant 0 : i32
    return %c0_i32, %arg0 : i32, i32
  }
  func.func @transform_2(%arg0: i32) -> (i32, i32) {
    %c0_i32 = arith.constant 0 : i32
    %c0_i32_0 = arith.constant 0 : i32
    return %c0_i32, %arg0 : i32, i32
  }
}

</mosaic_0001>

<bundles_post_ra>
// kernel: tpu_custom_call.1
= control target key start
LH: loop header
LB: loop body
LE: loop exit
PB: predicated region body
PF: predicated region fallthrough
CT: control target
= control target key end

     0   :  { %7 = vsyncpa [#allocation3], 0  ;;  %s141_s0 = inlined_call_operand.hbm [shape: f32[1,160], index: 0, kind: input, shape index: {}]   ;;  %s142_s1 = inlined_call_operand.vmem [shape: f32[1,160], index: 1, kind: input, shape index: {}]   ;;  %s143_s2 = inlined_call_operand.hbm [shape: f32[1,160], index: 2, kind: output, shape index: {}]  }
   0x1   :  { %8 = vsyncpa [#allocation4], 0  ;;  %s97_s9 = smov [#allocation2]   ;;  %s49_s13 = scalar_lea.hbm %s141_s0, 32 }
   0x2   :  { %s15_s10 = sshll.u32 %s97_s9, 4  ;;  %p50_p0 = scmp.ne.s32.totalorder %s141_s0, %s49_s13  ;;  %s16_s10 = int_to_ptr.vmem [resolvable:$true] %s15_s10 }
   0x3   :  { %p53_p1 = scmp.lt.u32.totalorder %s49_s13, %s141_s0 }
   0x5   :  { %p55_p2 = pnand %p53_p1, %p50_p0 }
   0x7   :  { %58 = shalt.err (!%p55_p2)
}
   0x8   :  { %s59_s18 = scalar_lea.vmem %s16_s10, 32  ;;  %p64_p4 = scmp.lt.s32.totalorder %s16_s10, %s16_s10 }
   0x9   :  { %p60_p3 = scmp.ne.s32.totalorder %s16_s10, %s59_s18  ;;  %p65_p5 = scmp.lt.s32.totalorder %s59_s18, %s59_s18 }
   0xb   :  { %p66_p6 = por %p65_p5, %p64_p4 }
   0xd   :  { %p67_p7 = pnand %p66_p6, %p60_p3 }
   0xf   :  { %70 = shalt.err (!%p67_p7)
}
  0x10   :  { %18 = dma.hbm_to_vmem [thread:$0]  %s141_s0, 32, %s16_s10, [#allocation3]  }
  0x11   :  { %93 = dma.done.wait [#allocation3], 32  }
  0x12   :  { %94 = vsyncadd [#allocation3], 4294967264  ;;  %v27_v0 = vlaneseq  ;;  %s98_s21 = smov [#allocation5]   ;;  %v24_v1 = vld [vmem:[#allocation2] sm:$0x3] }
  0x13   :  { %s38_s22 = sshll.u32 %s98_s21, 4  ;;  %v25_v2 = vld [vmem:[%s142_s1] sm:$0x3]  ;;  %s39_s22 = int_to_ptr.vmem [resolvable:$true] %s38_s22 }
  0x14   :  { %vm29_vm0 = vcmp.lt.s32.totalorder %v27_v0, 160  ;;  %v26_v3 = vadd.f32 %v25_v2, %v24_v1  ;;  %s71_s25 = scalar_lea.vmem %s39_s22, 32  ;;  %p76_p9 = scmp.lt.s32.totalorder %s39_s22, %s39_s22 }
  0x15   :  { %p72_p8 = scmp.ne.s32.totalorder %s39_s22, %s71_s25  ;;  %p77_p10 = scmp.lt.s32.totalorder %s71_s25, %s71_s25 }
  0x16   :  { %31 = vst.msk [vmem:[#allocation5] sm:$0x3] %vm29_vm0, %v26_v3 }
  0x17   :  { %p78_p11 = por %p77_p10, %p76_p9 }
  0x19   :  { %p79_p12 = pnand %p78_p11, %p72_p8 }
  0x1b   :  { %82 = shalt.err (!%p79_p12)
}
  0x1c   :  { %s83_s27 = scalar_lea.hbm %s143_s2, 32 }
  0x1d   :  { %p84_p13 = scmp.ne.s32.totalorder %s143_s2, %s83_s27  ;;  %p87_p0 = scmp.lt.u32.totalorder %s83_s27, %s143_s2 }
  0x1f   :  { %p89_p1 = pnand %p87_p0, %p84_p13 }
  0x21   :  { %92 = shalt.err (!%p89_p1)
}
  0x22   :  { %41 = dma.vmem_to_hbm [thread:$0]  %s39_s22, 32, %s143_s2, [#allocation4]  }
  0x23   :  { %95 = dma.done.wait [#allocation4], 32  }
  0x24   :  { %96 = vsyncadd [#allocation4], 4294967264 }
  0x25   :  { %45 = vsyncpa [#allocation3], 1 }
  0x26   :  { %46 = vsyncpa [#allocation4], 1 }

</bundles_post_ra>
